<compile_context>
chip_gen: v7x
topology: tpu7x:2x2x1
jax: 0.10.0
libtpu: 0.0.40
codegen_flags: <defaults>
</compile_context>

<pallas_src>
import functools

import jax
import jax.numpy as jnp
from jax.experimental import pallas as pl
from jax.experimental.pallas import tpu as pltpu

HIDDEN = 256
LN_EPS = 1e-5
LANE = 128


def _round_up(x, m):
    return ((x + m - 1) // m) * m


def _chip_supports_bf16_vpu():
    """True on chips with bf16 VPU/EUP (v6e, v7x); False on v5e and unknown."""
    try:
        kind = jax.devices()[0].device_kind.lower()
    except Exception:
        return False
    return ("v6" in kind) or ("v7" in kind) or ("tpu7" in kind)


def _choose_batch_tile(batch, cap=1024):
    """Batch tile: multiple of 8, <= cap, and (when batch allows) >= 2 grid
    steps so both v7x TensorCores get work."""
    if batch <= 8:
        return batch
    half = (batch + 1) // 2
    return min(cap, _round_up(half, 8))


# --------------------------------- kernel ---------------------------------

def _layernorm_tanh(h, gamma, beta, tanh_dtype):
    """LayerNorm with f32 statistics, then tanh in `tanh_dtype`; returns bf16."""
    mu = jnp.mean(h, axis=-1, keepdims=True)
    d = h - mu                                   # bind once (no second broadcast+sub)
    var = jnp.mean(d * d, axis=-1, keepdims=True)
    y = d * jax.lax.rsqrt(var + LN_EPS) * gamma + beta
    # tanh on the EUP: bf16 on v6e/v7x, f32 on v5e (no bf16 EUP/VPU there).
    return jnp.tanh(y.astype(tanh_dtype)).astype(jnp.bfloat16)


def actor_kernel(x_ref, w1_ref, w2_ref, w3_ref, vec_ref, mean_ref, *,
                 bf16_elementwise):
    tanh_dtype = jnp.bfloat16 if bf16_elementwise else jnp.float32
    act_pad = mean_ref.shape[1]

    x = x_ref[...].astype(jnp.bfloat16)      # f32 in HBM, cast in-kernel
    vec = vec_ref[...]                       # (8, HIDDEN) f32: b1,g1,be1,b2,g2,be2,b3pad,0

    # Layer 1: Linear -> LayerNorm -> Tanh
    h = jnp.dot(x, w1_ref[...], preferred_element_type=jnp.float32) + vec[0:1, :]
    h = _layernorm_tanh(h, vec[1:2, :], vec[2:3, :], tanh_dtype)

    # Layer 2: Linear -> LayerNorm -> Tanh
    h = jnp.dot(h, w2_ref[...], preferred_element_type=jnp.float32) + vec[3:4, :]
    h = _layernorm_tanh(h, vec[4:5, :], vec[5:6, :], tanh_dtype)

    # Output head (std=0.01 init), lane-padded to act_pad; dtype per mean_ref.
    out = (jnp.dot(h, w3_ref[...], preferred_element_type=jnp.float32)
           + vec[6:7, :act_pad])
    mean_ref[...] = out.astype(mean_ref.dtype)


# --------------------------------- wrapper ---------------------------------

def prepare_actor_params(params):
    """One-time parameter preprocessing, hoisted out of the per-call path."""
    act_dim = params["w3"].shape[1]
    act_pad = _round_up(act_dim, LANE)
    assert act_pad <= HIDDEN, "packed-bias slab assumes act_dim <= 256"

    w3 = jnp.zeros((HIDDEN, act_pad), jnp.bfloat16).at[:, :act_dim].set(
        params["w3"].astype(jnp.bfloat16))
    b3_pad = jnp.zeros((1, HIDDEN), jnp.float32).at[0, :act_dim].set(params["b3"][0])
    vec = jnp.concatenate(
        [params["b1"], params["g1"], params["be1"],
         params["b2"], params["g2"], params["be2"],
         b3_pad, jnp.zeros((1, HIDDEN), jnp.float32)],
        axis=0).astype(jnp.float32)                       # (8, HIDDEN)
    return {
        "w1": params["w1"].astype(jnp.bfloat16),
        "w2": params["w2"].astype(jnp.bfloat16),
        "w3": w3,                                         # (HIDDEN, act_pad) bf16
        "vec": vec,
        "std": jnp.exp(params["logstd"]).astype(jnp.float32),   # (1, act_dim)
    }


def actor_forward(x, prepared, *, tb=None, tile_cap=1024,
                  mean_dtype=None, bf16_elementwise=None):
    """Actor forward pass. Returns (action_mean, action_std), both float32."""
    B, obs_dim = x.shape
    w1, w2, w3, vec = prepared["w1"], prepared["w2"], prepared["w3"], prepared["vec"]
    std1 = prepared["std"]
    act_dim = std1.shape[1]
    act_pad = w3.shape[1]
    assert w1.shape == (obs_dim, HIDDEN)

    bf16_chip = _chip_supports_bf16_vpu()
    if bf16_elementwise is None:
        bf16_elementwise = bf16_chip
    if mean_dtype is None:
        # bf16 halves the lane-padded writeback on v6e/v7x; the act_dim slice
        # in the wrapper casts back to f32 (tiny).  v5e keeps f32 (MXU-bound).
        mean_dtype = jnp.bfloat16 if bf16_chip else jnp.float32

    if tb is None:
        tb = _choose_batch_tile(B, tile_cap)
    assert tb % 8 == 0 or tb >= B, "batch tile must be a multiple of 8 (or cover B)"

    grid_b = -(-B // tb)
    b_pad = grid_b * tb
    x_in = x if b_pad == B else jnp.pad(x, ((0, b_pad - B), (0, 0)))

    full2d = lambda r, c: pl.BlockSpec((r, c), lambda i: (0, 0))
    mean_bytes = jnp.dtype(mean_dtype).itemsize

    flops = 2 * b_pad * (obs_dim * HIDDEN + HIDDEN * HIDDEN + HIDDEN * act_pad)
    bytes_accessed = (x_in.size * 4 + w1.size * 2 + w2.size * 2 + w3.size * 2
                      + vec.size * 4 + b_pad * act_pad * mean_bytes)

    kernel = functools.partial(actor_kernel, bf16_elementwise=bf16_elementwise)

    mean_padded = pl.pallas_call(
        kernel,
        out_shape=jax.ShapeDtypeStruct((b_pad, act_pad), mean_dtype),
        grid_spec=pltpu.PrefetchScalarGridSpec(
            num_scalar_prefetch=0,
            grid=(grid_b,),
            in_specs=[
                pl.BlockSpec((tb, obs_dim), lambda i: (i, 0)),   # x  (batch-tiled, f32)
                full2d(obs_dim, HIDDEN),                         # w1 (bf16, resident)
                full2d(HIDDEN, HIDDEN),                          # w2 (bf16, resident)
                full2d(HIDDEN, act_pad),                         # w3 (bf16, lane-padded)
                full2d(8, HIDDEN),                               # packed b/gamma/beta (f32)
            ],
            out_specs=pl.BlockSpec((tb, act_pad), lambda i: (i, 0)),
        ),
        compiler_params=pltpu.CompilerParams(
            dimension_semantics=("parallel",),
            vmem_limit_bytes=32 * 1024 * 1024,
        ),
        cost_estimate=pl.CostEstimate(
            flops=flops,
            transcendentals=2 * b_pad * HIDDEN,
            bytes_accessed=bytes_accessed,
        ),
    )(x_in, w1, w2, w3, vec)

    mean = mean_padded[:B, :act_dim].astype(jnp.float32)
    # std does not depend on x -> exp(logstd) precomputed once in prepare().
    std = jnp.broadcast_to(std1, mean.shape)
    return mean, std


# ------------------------- deterministic parameter init -------------------------

def _orthogonal(key, n_in, n_out, gain):
    """Orthogonal init (torch.nn.init.orthogonal_ semantics), returned as [in, out]."""
    rows, cols = max(n_in, n_out), min(n_in, n_out)
    a = jax.random.normal(key, (rows, cols), dtype=jnp.float32)
    q, r = jnp.linalg.qr(a)
    q = q * jnp.sign(jnp.diagonal(r))          # make decomposition unique
    if n_in < n_out:
        q = q.T
    return (gain * q[:n_in, :n_out]).astype(jnp.float32)


def init_actor_params(key, obs_dim, act_dim):
    k1, k2, k3 = jax.random.split(key, 3)
    sqrt2 = float(jnp.sqrt(2.0))
    return {
        "w1": _orthogonal(k1, obs_dim, HIDDEN, sqrt2),
        "b1": jnp.zeros((1, HIDDEN), jnp.float32),
        "g1": jnp.ones((1, HIDDEN), jnp.float32),
        "be1": jnp.zeros((1, HIDDEN), jnp.float32),
        "w2": _orthogonal(k2, HIDDEN, HIDDEN, sqrt2),
        "b2": jnp.zeros((1, HIDDEN), jnp.float32),
        "g2": jnp.ones((1, HIDDEN), jnp.float32),
        "be2": jnp.zeros((1, HIDDEN), jnp.float32),
        "w3": _orthogonal(k3, HIDDEN, act_dim, 0.01),
        "b3": jnp.zeros((1, act_dim), jnp.float32),
        "logstd": jnp.zeros((1, act_dim), jnp.float32),  # nn.Parameter(zeros)
    }


# ------------------------------ reference (plain JAX) ------------------------------

def _layernorm_ref(h, gamma, beta):
    mu = jnp.mean(h, axis=-1, keepdims=True)
    var = jnp.mean((h - mu) * (h - mu), axis=-1, keepdims=True)
    return (h - mu) * jax.lax.rsqrt(var + LN_EPS) * gamma + beta


def actor_forward_ref(x, p, *, bf16_matmul=True):
    cast = (lambda a: a.astype(jnp.bfloat16)) if bf16_matmul else (lambda a: a)
    h = jnp.dot(cast(x), cast(p["w1"]), preferred_element_type=jnp.float32) + p["b1"]
    h = jnp.tanh(_layernorm_ref(h, p["g1"], p["be1"]))
    h = jnp.dot(cast(h), cast(p["w2"]), preferred_element_type=jnp.float32) + p["b2"]
    h = jnp.tanh(_layernorm_ref(h, p["g2"], p["be2"]))
    mean = jnp.dot(cast(h), cast(p["w3"]), preferred_element_type=jnp.float32) + p["b3"]
    std = jnp.broadcast_to(jnp.exp(p["logstd"]), mean.shape)
    return mean, std


if __name__ == "__main__":
    key = jax.random.PRNGKey(0)
    kp, kx1, kx2 = jax.random.split(key, 3)

    OBS, ACT = 32, 8                       # shapes consistent with a small Box env
    params = init_actor_params(kp, OBS, ACT)
    prepared = prepare_actor_params(params)      # one-time prep, hoisted out of calls

    fwd = jax.jit(actor_forward)                 # auto tile + chip-selected dtypes
    fwd_f32 = jax.jit(functools.partial(         # forced v5e-style path (f32 everywhere
        actor_forward, mean_dtype=jnp.float32,   #  except bf16 MXU operands)
        bf16_elementwise=False))

    # Case 1: B=64 -> tb=32, grid=2 (both TensorCores on v7x), auto dtypes.
    x1 = jax.random.normal(kx1, (64, OBS), dtype=jnp.float32)
    mean1, std1 = fwd(x1, prepared)
    # Case 2: non-divisible batch (B=20 -> tb=16, padded to 32), forced f32 path.
    x2 = jax.random.normal(kx2, (20, OBS), dtype=jnp.float32)
    mean2, std2 = fwd_f32(x2, prepared)
    jax.block_until_ready((mean1, std1, mean2, std2))

    ref1_mean, ref1_std = actor_forward_ref(x1, params, bf16_matmul=True)
    f32_mean1, _ = actor_forward_ref(x1, params, bf16_matmul=False)
    ref2_mean, ref2_std = actor_forward_ref(x2, params, bf16_matmul=True)

    assert mean1.shape == (64, ACT) and std1.shape == (64, ACT)
    assert mean2.shape == (20, ACT) and std2.shape == (20, ACT)
    # Mixed-precision reference (bf16 MXU operands, f32 elsewhere).
    assert jnp.allclose(mean1, ref1_mean, atol=3e-3, rtol=3e-2)
    assert jnp.allclose(mean2, ref2_mean, atol=1e-4, rtol=1e-3)
    # Full-f32 reference: looser tolerance (kernel uses bf16 MXU operands).
    assert jnp.allclose(mean1, f32_mean1, atol=2e-2, rtol=2e-2)
    assert jnp.allclose(std1, ref1_std, atol=1e-6, rtol=1e-6)
    assert jnp.allclose(std2, ref2_std, atol=1e-6, rtol=1e-6)

    print("KERNEL_OK")
</pallas_src>

<mosaic_0001>
module attributes {stable_mosaic.version = 11 : i64} {
  func.func @actor_kernel(%arg0: i32, %arg1: memref<32x32xf32, #tpu.memory_space<vmem>>, %arg2: memref<32x256xbf16, #tpu.memory_space<vmem>>, %arg3: memref<256x256xbf16, #tpu.memory_space<vmem>>, %arg4: memref<256x128xbf16, #tpu.memory_space<vmem>>, %arg5: memref<8x256xf32, #tpu.memory_space<vmem>>, %arg6: memref<32x128xf32, #tpu.memory_space<vmem>>) attributes {dimension_semantics = [#tpu.dimension_semantics<parallel>], iteration_bounds = array<i64: 2>, scalar_prefetch = 0 : i64, scratch_operands = 0 : i64, tpu.core_type = #tpu.core_type<tc>, window_params = [{transform_indices = @transform_0, window_bounds = array<i64: 32, 32>}, {pipeline_mode = #tpu.pipeline_mode<synchronous>, transform_indices = @transform_1, window_bounds = array<i64: 32, 256>}, {pipeline_mode = #tpu.pipeline_mode<synchronous>, transform_indices = @transform_2, window_bounds = array<i64: 256, 256>}, {pipeline_mode = #tpu.pipeline_mode<synchronous>, transform_indices = @transform_3, window_bounds = array<i64: 256, 128>}, {pipeline_mode = #tpu.pipeline_mode<synchronous>, transform_indices = @transform_4, window_bounds = array<i64: 8, 256>}, {transform_indices = @transform_5, window_bounds = array<i64: 32, 128>}]} {
    %c0 = arith.constant 0 : index
    %c0_0 = arith.constant 0 : index
    %0 = vector.load %arg1[%c0, %c0_0] : memref<32x32xf32, #tpu.memory_space<vmem>>, vector<32x32xf32>
    %1 = arith.truncf %0 : vector<32x32xf32> to vector<32x32xbf16>
    %c0_1 = arith.constant 0 : index
    %c0_2 = arith.constant 0 : index
    %2 = vector.load %arg5[%c0_1, %c0_2] : memref<8x256xf32, #tpu.memory_space<vmem>>, vector<8x256xf32>
    %c0_3 = arith.constant 0 : index
    %c0_4 = arith.constant 0 : index
    %3 = vector.load %arg2[%c0_3, %c0_4] : memref<32x256xbf16, #tpu.memory_space<vmem>>, vector<32x256xbf16>
    %cst = arith.constant dense<0.000000e+00> : vector<32x256xf32>
    %4 = tpu.matmul %1, %3, %cst {dimension_numbers = #tpu.dot_dimension_numbers<[1], [0], [0], [1], [0, 0, 1, 1], [], []>} : vector<32x32xbf16>, vector<32x256xbf16>, vector<32x256xf32> -> vector<32x256xf32>
    %5 = vector.extract_strided_slice %2 {offsets = [0, 0], sizes = [1, 256], strides = [1, 1]} : vector<8x256xf32> to vector<1x256xf32>
    %6 = vector.broadcast %5 : vector<1x256xf32> to vector<32x256xf32>
    %7 = arith.addf %4, %6 : vector<32x256xf32>
    %8 = vector.extract_strided_slice %2 {offsets = [1, 0], sizes = [1, 256], strides = [1, 1]} : vector<8x256xf32> to vector<1x256xf32>
    %9 = vector.extract_strided_slice %2 {offsets = [2, 0], sizes = [1, 256], strides = [1, 1]} : vector<8x256xf32> to vector<1x256xf32>
    %cst_5 = arith.constant dense<0.000000e+00> : vector<32xf32>
    %10 = vector.multi_reduction <add>, %7, %cst_5 [1] : vector<32x256xf32> to vector<32xf32>
    %11 = vector.shape_cast %10 : vector<32xf32> to vector<32x1xf32>
    %cst_6 = arith.constant 2.560000e+02 : f32
    %12 = vector.broadcast %cst_6 : f32 to vector<32x1xf32>
    %13 = arith.divf %11, %12 : vector<32x1xf32>
    %14 = vector.broadcast %13 : vector<32x1xf32> to vector<32x256xf32>
    %15 = arith.subf %7, %14 : vector<32x256xf32>
    %16 = arith.mulf %15, %15 : vector<32x256xf32>
    %cst_7 = arith.constant dense<0.000000e+00> : vector<32xf32>
    %17 = vector.multi_reduction <add>, %16, %cst_7 [1] : vector<32x256xf32> to vector<32xf32>
    %18 = vector.shape_cast %17 : vector<32xf32> to vector<32x1xf32>
    %cst_8 = arith.constant 2.560000e+02 : f32
    %19 = vector.broadcast %cst_8 : f32 to vector<32x1xf32>
    %20 = arith.divf %18, %19 : vector<32x1xf32>
    %cst_9 = arith.constant 9.99999974E-6 : f32
    %21 = vector.broadcast %cst_9 : f32 to vector<32x1xf32>
    %22 = arith.addf %20, %21 : vector<32x1xf32>
    %23 = math.rsqrt %22 : vector<32x1xf32>
    %24 = vector.broadcast %23 : vector<32x1xf32> to vector<32x256xf32>
    %25 = arith.mulf %15, %24 : vector<32x256xf32>
    %26 = vector.broadcast %8 : vector<1x256xf32> to vector<32x256xf32>
    %27 = arith.mulf %25, %26 : vector<32x256xf32>
    %28 = vector.broadcast %9 : vector<1x256xf32> to vector<32x256xf32>
    %29 = arith.addf %27, %28 : vector<32x256xf32>
    %30 = math.tanh %29 : vector<32x256xf32>
    %31 = arith.truncf %30 : vector<32x256xf32> to vector<32x256xbf16>
    %c0_10 = arith.constant 0 : index
    %c0_11 = arith.constant 0 : index
    %32 = vector.load %arg3[%c0_10, %c0_11] : memref<256x256xbf16, #tpu.memory_space<vmem>>, vector<256x256xbf16>
    %cst_12 = arith.constant dense<0.000000e+00> : vector<32x256xf32>
    %33 = tpu.matmul %31, %32, %cst_12 {dimension_numbers = #tpu.dot_dimension_numbers<[1], [0], [0], [1], [0, 0, 1, 1], [], []>} : vector<32x256xbf16>, vector<256x256xbf16>, vector<32x256xf32> -> vector<32x256xf32>
    %34 = vector.extract_strided_slice %2 {offsets = [3, 0], sizes = [1, 256], strides = [1, 1]} : vector<8x256xf32> to vector<1x256xf32>
    %35 = vector.broadcast %34 : vector<1x256xf32> to vector<32x256xf32>
    %36 = arith.addf %33, %35 : vector<32x256xf32>
    %37 = vector.extract_strided_slice %2 {offsets = [4, 0], sizes = [1, 256], strides = [1, 1]} : vector<8x256xf32> to vector<1x256xf32>
    %38 = vector.extract_strided_slice %2 {offsets = [5, 0], sizes = [1, 256], strides = [1, 1]} : vector<8x256xf32> to vector<1x256xf32>
    %cst_13 = arith.constant dense<0.000000e+00> : vector<32xf32>
    %39 = vector.multi_reduction <add>, %36, %cst_13 [1] : vector<32x256xf32> to vector<32xf32>
    %40 = vector.shape_cast %39 : vector<32xf32> to vector<32x1xf32>
    %cst_14 = arith.constant 2.560000e+02 : f32
    %41 = vector.broadcast %cst_14 : f32 to vector<32x1xf32>
    %42 = arith.divf %40, %41 : vector<32x1xf32>
    %43 = vector.broadcast %42 : vector<32x1xf32> to vector<32x256xf32>
    %44 = arith.subf %36, %43 : vector<32x256xf32>
    %45 = arith.mulf %44, %44 : vector<32x256xf32>
    %cst_15 = arith.constant dense<0.000000e+00> : vector<32xf32>
    %46 = vector.multi_reduction <add>, %45, %cst_15 [1] : vector<32x256xf32> to vector<32xf32>
    %47 = vector.shape_cast %46 : vector<32xf32> to vector<32x1xf32>
    %cst_16 = arith.constant 2.560000e+02 : f32
    %48 = vector.broadcast %cst_16 : f32 to vector<32x1xf32>
    %49 = arith.divf %47, %48 : vector<32x1xf32>
    %cst_17 = arith.constant 9.99999974E-6 : f32
    %50 = vector.broadcast %cst_17 : f32 to vector<32x1xf32>
    %51 = arith.addf %49, %50 : vector<32x1xf32>
    %52 = math.rsqrt %51 : vector<32x1xf32>
    %53 = vector.broadcast %52 : vector<32x1xf32> to vector<32x256xf32>
    %54 = arith.mulf %44, %53 : vector<32x256xf32>
    %55 = vector.broadcast %37 : vector<1x256xf32> to vector<32x256xf32>
    %56 = arith.mulf %54, %55 : vector<32x256xf32>
    %57 = vector.broadcast %38 : vector<1x256xf32> to vector<32x256xf32>
    %58 = arith.addf %56, %57 : vector<32x256xf32>
    %59 = math.tanh %58 : vector<32x256xf32>
    %60 = arith.truncf %59 : vector<32x256xf32> to vector<32x256xbf16>
    %c0_18 = arith.constant 0 : index
    %c0_19 = arith.constant 0 : index
    %61 = vector.load %arg4[%c0_18, %c0_19] : memref<256x128xbf16, #tpu.memory_space<vmem>>, vector<256x128xbf16>
    %cst_20 = arith.constant dense<0.000000e+00> : vector<32x128xf32>
    %62 = tpu.matmul %60, %61, %cst_20 {dimension_numbers = #tpu.dot_dimension_numbers<[1], [0], [0], [1], [0, 0, 1, 1], [], []>} : vector<32x256xbf16>, vector<256x128xbf16>, vector<32x128xf32> -> vector<32x128xf32>
    %63 = vector.extract_strided_slice %2 {offsets = [6, 0], sizes = [1, 128], strides = [1, 1]} : vector<8x256xf32> to vector<1x128xf32>
    %64 = vector.broadcast %63 : vector<1x128xf32> to vector<32x128xf32>
    %65 = arith.addf %62, %64 : vector<32x128xf32>
    %c0_21 = arith.constant 0 : index
    %c0_22 = arith.constant 0 : index
    %66 = vector.load %arg6[%c0_21, %c0_22] : memref<32x128xf32, #tpu.memory_space<vmem>>, vector<32x128xf32>
    tpu.vector_store %arg6[%c0_21, %c0_22], %65 {strides = array<i32>} : memref<32x128xf32, #tpu.memory_space<vmem>>, vector<32x128xf32>,
    return
  }
  func.func @transform_0(%arg0: i32) -> (i32, i32) {
    %c0_i32 = arith.constant 0 : i32
    %c0_i32_0 = arith.constant 0 : i32
    return %arg0, %c0_i32 : i32, i32
  }
  func.func @transform_1(%arg0: i32) -> (i32, i32) {
    %c0_i32 = arith.constant 0 : i32
    %c0_i32_0 = arith.constant 0 : i32
    %c0_i32_1 = arith.constant 0 : i32
    return %c0_i32, %c0_i32_0 : i32, i32
  }
  func.func @transform_2(%arg0: i32) -> (i32, i32) {
    %c0_i32 = arith.constant 0 : i32
    %c0_i32_0 = arith.constant 0 : i32
    %c0_i32_1 = arith.constant 0 : i32
    return %c0_i32, %c0_i32_0 : i32, i32
  }
  func.func @transform_3(%arg0: i32) -> (i32, i32) {
    %c0_i32 = arith.constant 0 : i32
    %c0_i32_0 = arith.constant 0 : i32
    %c0_i32_1 = arith.constant 0 : i32
    return %c0_i32, %c0_i32_0 : i32, i32
  }
  func.func @transform_4(%arg0: i32) -> (i32, i32) {
    %c0_i32 = arith.constant 0 : i32
    %c0_i32_0 = arith.constant 0 : i32
    %c0_i32_1 = arith.constant 0 : i32
    return %c0_i32, %c0_i32_0 : i32, i32
  }
  func.func @transform_5(%arg0: i32) -> (i32, i32) {
    %c0_i32 = arith.constant 0 : i32
    %c0_i32_0 = arith.constant 0 : i32
    return %arg0, %c0_i32 : i32, i32
  }
}

</mosaic_0001>

<bundles_post_ra>
// kernel: actor_forward.1
= control target key start
LH: loop header
LB: loop body
LE: loop exit
PB: predicated region body
PF: predicated region fallthrough
CT: control target
= control target key end

     0   :  { %10 = vsyncpa [#allocation3], 0  ;;  %s1677_s0 = inlined_call_operand.vmem [shape: f32[64,32], index: 0, kind: input, shape index: {}]   ;;  %s1678_s1 = inlined_call_operand.vmem [shape: bf16[32,256], index: 1, kind: input, shape index: {}]   ;;  %s1679_s2 = inlined_call_operand.hbm [shape: bf16[256,256], index: 2, kind: input, shape index: {}]   ;;  %s1680_s3 = inlined_call_operand.hbm [shape: bf16[256,128], index: 3, kind: input, shape index: {}]   ;;  %s1681_s4 = inlined_call_operand.vmem [shape: f32[8,256], index: 4, kind: input, shape index: {}]   ;;  %s1682_s5 = inlined_call_operand.vmem [shape: f32[64,128], index: 5, kind: output, shape index: {}]  }
   0x1   :  { %11 = vsyncpa [#allocation5], 0  ;;  %s1450_s18 = smov 0  }
   0x2 LB: > { %s1413_s19 = smov [#allocation2]   ;;  %s1092_s21 = sadd.s32 4294967295, %s1411_s18   ;;  %s1411_s18 = sphi %s1450_s18, %s17_s18  }
   0x3   : > { %s173_s20 = sshll.u32 %s1413_s19, 4  ;;  %p1094_p0 = scmp.ge.s32.totalorder %s1411_s18, 1  ;;  %s174_s20 = int_to_ptr.vmem [resolvable:$true] %s173_s20 }
   0x4   : > { %p158_p1 = scmp.lt.s32.totalorder %s1411_s18, 3  ;;  %p1464_p3 = scmp.eq.s32.totalorder %s1092_s21, 0 }
   0x5   : > { %s1414_s24 = smov [#allocation4]   ;;  %s1341_s29 = scalar_lea.hbm %s1679_s2, 4096 }
   0x6   : > { %p1458_p2 = pnand %p1094_p0, %p158_p1  ;;  %s186_s25 = sshll.u32 %s1414_s24, 4  ;;  %s1476_s25 = int_to_ptr.vmem [resolvable:$true] %s186_s25 }
   0x7   : > { %s1687_s23 = scalar_select %p1464_p3, 1, 0 }
   0x8   : > { %s1686_s22 = scalar_select %p1458_p2, 1, 0 }
   0x9   : > { %p1197_p4 = pneg %p1458_p2  ;;  %p1342_p6 = scmp.ne.s32.totalorder %s1679_s2, %s1341_s29 }
   0xa   : > { %p1348_p10 = scmp.lt.u32.totalorder %s1341_s29, %s1679_s2 }
   0xb   : > { %p1472_p5 = pnand %p1464_p3, %p1197_p4 }
   0xd   : > { %p1343_p7 = pneg %p1472_p5 }
   0xf   : > { %p1344_p8 = pnand %p1343_p7, %p1342_p6 }
  0x11   : > { %p1345_p9 = pneg %p1344_p8 }
  0x13   : > { %p1350_p11 = pnand %p1348_p10, %p1345_p9 }
  0x15   : > { %1353 = shalt.err (!%p1350_p11)
}
  0x16   : > { %s1354_s9 = scalar_lea.vmem %s174_s20, 4096  ;;  %p1362_p1 = scmp.lt.s32.totalorder %s174_s20, %s174_s20 }
  0x17   : > { %p1355_p12 = scmp.ne.s32.totalorder %s174_s20, %s1354_s9  ;;  %p1363_p4 = scmp.lt.s32.totalorder %s1354_s9, %s1354_s9 }
  0x19   : > { %p1357_p13 = pnand %p1355_p12, %p1343_p7  ;;  %p1364_p3 = por %p1363_p4, %p1362_p1 }
  0x1b   : > { %p1358_p0 = pneg %p1357_p13 }
  0x1d   : > { %p1365_p2 = pnand %p1364_p3, %p1358_p0 }
  0x1f   : > { %1368 = shalt.err (!%p1365_p2)
}
  0x20   : > { %s1415_s10 = smov 128   ;;  %s1416_s11 = smov 8  }
  0x21   : > { %1200 = dma.hbm_to_vmem [thread:$0]  (!%p1472_p5), %s1679_s2, 4096, %s174_s20, [#allocation3], %s1415_s10, %s1415_s10, %s1416_s11  }
  0x22   : > { %s1369_s16 = scalar_lea.hbm %s1680_s3, 2048 }
  0x23   : > { %p1370_p6 = scmp.ne.s32.totalorder %s1680_s3, %s1369_s16  ;;  %p1376_p8 = scmp.lt.u32.totalorder %s1369_s16, %s1680_s3 }
  0x25   : > { %p1372_p2 = pnand %p1370_p6, %p1343_p7 }
  0x27   : > { %p1373_p3 = pneg %p1372_p2 }
  0x29   : > { %p1378_p9 = pnand %p1376_p8, %p1373_p3 }
  0x2b   : > { %1381 = shalt.err (!%p1378_p9)
}
  0x2c   : > { %s1382_s20 = scalar_lea.vmem %s1476_s25, 2048  ;;  %p1390_p13 = scmp.lt.s32.totalorder %s1476_s25, %s1476_s25 }
  0x2d   : > { %p1383_p10 = scmp.ne.s32.totalorder %s1476_s25, %s1382_s20  ;;  %p1391_p0 = scmp.lt.s32.totalorder %s1382_s20, %s1382_s20 }
  0x2f   : > { %p1385_p11 = pnand %p1383_p10, %p1343_p7  ;;  %p1392_p1 = por %p1391_p0, %p1390_p13 }
  0x31   : > { %p1386_p12 = pneg %p1385_p11 }
  0x33   : > { %p1393_p4 = pnand %p1392_p1, %p1386_p12 }
  0x35   : > { %1396 = shalt.err (!%p1393_p4)
}
  0x36   : > { %s1417_s28 = smov 64   ;;  %s1418_s29 = smov 4  }
  0x37   : > { %1203 = dma.hbm_to_vmem [thread:$0]  (!%p1472_p5), %s1680_s3, 2048, %s1476_s25, [#allocation5], %s1417_s28, %s1417_s28, %s1418_s29  }
  0x38   : > { %p1689_p6 = scmp.ne.s32.totalorder %s1686_s22, 0 }
  0x39   : > { %p1690_p7 = scmp.ne.s32.totalorder (!%p1689_p6), %s1687_s23, 0 }
  0x3a   : > { %214 = sbr.rel (%p1689_p6) target bundleno = 1400 (0x578), region = 40 }
  0x41   : > { %1402 = dma.done.wait (%p1690_p7), [#allocation3], 4096  }
  0x42   : > { %1404 = vsyncadd (%p1690_p7), [#allocation3], 4294963200 }
  0x43   : > { %1406 = dma.done.wait (%p1690_p7), [#allocation5], 2048  }
  0x44   : > { %1408 = vsyncadd (%p1690_p7), [#allocation5], 4294965248  ;;  %s1101_s26 = sshll.u32 %s1092_s21, 2  ;;  %v1419_v0 = vmov 0   ;;  %v1223_v1 = vld [vmem:[%s1678_s1 + $0x4] ss:$8 sps:$4 sm:$0xff]   ;;  %v271_v11 = vlaneseq }
  0x45   : > { %338 = vmatprep.mubr.bf16.mxu0 %v1419_v0  ;;  %p247_p5 = scmp.lt.s32.totalorder %s1101_s26, 7  ;;  %v1225_v2 = vld [vmem:[%s1678_s1] ss:$8 sps:$4 sm:$0xff]   ;;  %306 = vmatprep.subr.bf16.mxu0 %v1223_v1  ;;  %v1226_v3 = vld [vmem:[%s1678_s1 + $0x14] ss:$8 sps:$4 sm:$0xff]   ;;  %vm299_vm0 = vcmask 261120  }
  0x46   : > { %307 = vmatpush1.bf16.msra.mxu0 %v1225_v2  ;;  %v1228_v4 = vld [vmem:[%s1678_s1 + $0x10] ss:$8 sps:$4 sm:$0xff]   ;;  %v1557_v12 = vshrl.u32 %v271_v11, 7  ;;  %v1563_v14 = vld [vmem:[%s1681_s4] sm:$0xff]  ;;  %v1568_v15 = vld [vmem:[%s1681_s4 + $0x8] sm:$0xff] }
  0x47   : > { %s1692_s26 = smov (!%p247_p5, %s1101_s26), 7  ;;  %308 = vmatprep.subr.bf16.mxu0 %v1226_v3  ;;  %v1229_v38 = vld [vmem:[#allocation2 + $0x4] ss:$8 sps:$4 sm:$0xff]   ;;  %v1231_v39 = vld [vmem:[#allocation2] ss:$8 sps:$4 sm:$0xff]  }
  0x48   : > { %s1102_s22 = sshll.u32 %s1692_s26, 3  ;;  %v273_v13 = vsub.s32 0, %v1557_v12  ;;  %v1232_v40 = vld [vmem:[#allocation2 + $0x14] ss:$8 sps:$4 sm:$0xff]   ;;  %668 = vmatprep.subr.bf16.mxu1 %v1229_v38  ;;  %v1234_v41 = vld [vmem:[#allocation2 + $0x10] ss:$8 sps:$4 sm:$0xff]  }
  0x49   : > { %s250_s23 = scalar_lea.vmem %s1677_s0, %s1102_s22  ;;  %669 = vmatpush1.bf16.msra.mxu1 %v1231_v39  ;;  %v1235_v42 = vld [vmem:[#allocation2 + $0x24] ss:$8 sps:$4 sm:$0xff]   ;;  %v1237_v43 = vld [vmem:[#allocation2 + $0x20] ss:$8 sps:$4 sm:$0xff]   ;;  %v1238_v44 = vld [vmem:[#allocation2 + $0x34] ss:$8 sps:$4 sm:$0xff]   ;;  %s256_s20 = scalar_lea.vmem %s1682_s5, %s1102_s22 }
  0x4a   : > { %v259_v5 = vld [vmem:[%s250_s23] sm:$0xff]  ;;  %v260_v6 = vld [vmem:[%s250_s23 + $0x8] sm:$0xff]  ;;  %309 = vmatpush1.bf16.msra.mxu0 %v1228_v4  ;;  %v261_v8 = vld [vmem:[%s250_s23 + $0x10] sm:$0xff]  ;;  %v274_v16 = vrot.slane %v1563_v14, %v273_v13  ;;  %v278_v17 = vrot.slane %v1568_v15, %v273_v13  ;;  %670 = vmatprep.subr.bf16.mxu1 %v1232_v40 }
  0x4b   : > { %v263_v7 = vpack.c.bf16 %v260_v6, %v259_v5  ;;  %v262_v9 = vld [vmem:[%s250_s23 + $0x18] sm:$0xff]  ;;  %v1241_v46 = vld [vmem:[#allocation2 + $0x44] ss:$8 sps:$4 sm:$0xff]   ;;  %v1243_v47 = vld [vmem:[#allocation2 + $0x40] ss:$8 sps:$4 sm:$0xff]  }
  0x4c   : > { %v264_v10 = vpack.c.bf16 %v262_v9, %v261_v8  ;;  %v1240_v45 = vld [vmem:[#allocation2 + $0x30] ss:$8 sps:$4 sm:$0xff]   ;;  %v1244_v48 = vld [vmem:[#allocation2 + $0x54] ss:$8 sps:$4 sm:$0xff]   ;;  %v1247_v50 = vld [vmem:[#allocation2 + $0x64] ss:$8 sps:$4 sm:$0xff]  }
  0x4d   : > { %1109 = vmatmul.mubr.msk.bf16.vlgmr.msra.gmra.mrb[0].mxu0 %vm299_vm0, %v263_v7  ;;  %671 = vmatpush1.bf16.msra.mxu1 %v1234_v41  ;;  %v1246_v49 = vld [vmem:[#allocation2 + $0x50] ss:$8 sps:$4 sm:$0xff]  }
  0x4e   : > { %348 = vmatprep.mubr.bf16.mxu0 %v1419_v0  ;;  %672 = vmatprep.subr.bf16.mxu1 %v1235_v42 }
  0x51   : > { %673 = vmatpush1.bf16.msra.mxu1 %v1237_v43 }
  0x52   : > { %674 = vmatprep.subr.bf16.mxu1 %v1238_v44 }
  0x55   : > { %1110 = vmatmul.mubr.msk.bf16.gmra.mrb[4].mxu0 %vm299_vm0, %v264_v10  ;;  %675 = vmatpush1.bf16.msra.mxu1 %v1240_v45  ;;  %v426_v45 = vsub.s32 1, %v1557_v12 }
  0x56   : > { %676 = vmatprep.subr.bf16.mxu1 %v1241_v46 }
  0x59   : > { %677 = vmatpush1.bf16.msra.mxu1 %v1243_v47 }
  0x5a   : > { %678 = vmatprep.subr.bf16.mxu1 %v1244_v48  ;;  %v442_v48 = vsub.s32 2, %v1557_v12 }
  0x5d   : > { %679 = vmatpush1.bf16.msra.mxu1 %v1246_v49 }
  0x5e   : > { %680 = vmatprep.subr.bf16.mxu1 %v1247_v50  ;;  %v427_v50 = vrot.slane %v1563_v14, %v426_v45 }
 0x120   : > { %v340_v18 = vpop.f32.mrb[0].mxu0 }
 0x121   : > { %v341_v19 = vadd.f32 %v340_v18, %v274_v16  ;;  %v342_v20 = vpop.f32.mrb[1].mxu0  ;;  %v1249_v18 = vld [vmem:[#allocation2 + $0x60] ss:$8 sps:$4 sm:$0xff]  }
 0x122   : > { %v343_v21 = vadd.f32 %v342_v20, %v278_v17  ;;  %v344_v22 = vpop.f32.mrb[2].mxu0  ;;  %681 = vmatpush1.bf16.msra.mxu1 %v1249_v18  ;;  %v1252_v20 = vld [vmem:[#allocation2 + $0x70] ss:$8 sps:$4 sm:$0xff]  }
 0x123   : > { %v346_v23 = vpop.f32.mrb[3].mxu0  ;;  %v345_v24 = vadd.f32 %v344_v22, %v274_v16  ;;  %v1255_v22 = vld [vmem:[#allocation2 + $0x80] ss:$8 sps:$4 sm:$0xff]  }
 0x124   : > { %v347_v25 = vadd.f32 %v346_v23, %v278_v17  ;;  %v359_v26 = vadd.f32 %v343_v21, %v341_v19  ;;  %v1256_v23 = vld [vmem:[#allocation2 + $0x94] ss:$8 sps:$4 sm:$0xff]  }
 0x126   : > { %360 = vadd.xlane.f32.xlu0 %v359_v26  ;;  %v362_v28 = vadd.f32 %v347_v25, %v345_v24  ;;  %v1261_v26 = vld [vmem:[#allocation2 + $0xa0] ss:$8 sps:$4 sm:$0xff]  }
 0x128   : > { %v350_v27 = vpop.f32.mrb[4].mxu0 }
 0x129   : > { %v351_v29 = vadd.f32 %v350_v27, %v274_v16  ;;  %v352_v30 = vpop.f32.mrb[5].mxu0  ;;  %v1262_v27 = vld [vmem:[#allocation2 + $0xb4] ss:$8 sps:$4 sm:$0xff]  }
 0x12a   : > { %v353_v31 = vadd.f32 %v352_v30, %v278_v17  ;;  %v354_v32 = vpop.f32.mrb[6].mxu0  ;;  %363 = vadd.xlane.f32.xlu0 %v362_v28  ;;  %v1264_v28 = vld [vmem:[#allocation2 + $0xb0] ss:$8 sps:$4 sm:$0xff]   ;;  %v1267_v30 = vld [vmem:[#allocation2 + $0xc0] ss:$8 sps:$4 sm:$0xff]  }
 0x12b   : > { %v356_v33 = vpop.f32.mrb[7].mxu0  ;;  %v355_v34 = vadd.f32 %v354_v32, %v274_v16  ;;  %v1270_v32 = vld [vmem:[#allocation2 + $0xd0] ss:$8 sps:$4 sm:$0xff]  }
 0x12c   : > { %v357_v35 = vadd.f32 %v356_v33, %v278_v17  ;;  %v365_v36 = vadd.f32 %v353_v31, %v351_v29  ;;  %v1271_v33 = vld [vmem:[#allocation2 + $0xe4] ss:$8 sps:$4 sm:$0xff]  }
 0x12e   : > { %366 = vadd.xlane.f32.xlu1 %v365_v36  ;;  %v368_v37 = vadd.f32 %v357_v35, %v355_v34  ;;  %v1276_v36 = vld [vmem:[#allocation2 + $0xf0] ss:$8 sps:$4 sm:$0xff]  }
 0x132   : > { %369 = vadd.xlane.f32.xlu1 %v368_v37 }
 0x1b3   : > { %v361_v51 = vpop.xlane.xlu0 %360 }
 0x1b4   : > { %v372_v52 = vmul.f32 0.00390625, %v361_v51  ;;  %v431_v51 = vrot.slane %v1568_v15, %v426_v45 }
 0x1b6   : > { %v1572_v53 = vsub.f32 %v341_v19, %v372_v52  ;;  %v1574_v54 = vsub.f32 %v343_v21, %v372_v52  ;;  %v1250_v19 = vld [vmem:[#allocation2 + $0x74] ss:$8 sps:$4 sm:$0xff]   ;;  %v1253_v21 = vld [vmem:[#allocation2 + $0x84] ss:$8 sps:$4 sm:$0xff]  }
 0x1b7   : > { %v364_v55 = vpop.xlane.xlu0 %363  ;;  %682 = vmatprep.subr.bf16.mxu1 %v1250_v19 }
 0x1b8   : > { %v373_v56 = vmul.f32 0.00390625, %v364_v55  ;;  %v384_v57 = vmul.f32 %v1572_v53, %v1572_v53  ;;  %v385_v58 = vmul.f32 %v1574_v54, %v1574_v54  ;;  %683 = vmatpush1.bf16.msra.mxu1 %v1252_v20 }
 0x1b9   : > { %684 = vmatprep.subr.bf16.mxu1 %v1253_v21 }
 0x1ba   : > { %v1580_v59 = vsub.f32 %v345_v24, %v373_v56  ;;  %v1582_v60 = vsub.f32 %v347_v25, %v373_v56  ;;  %v392_v61 = vadd.f32 %v385_v58, %v384_v57  ;;  %v1258_v24 = vld [vmem:[#allocation2 + $0x90] ss:$8 sps:$4 sm:$0xff]   ;;  %v1259_v25 = vld [vmem:[#allocation2 + $0xa4] ss:$8 sps:$4 sm:$0xff]   ;;  %v447_v58 = vrot.slane %v1568_v15, %v442_v48 }
 0x1bb   : > { %v367_v62 = vpop.xlane.xlu1 %366 }
 0x1bc   : > { %v374_v63 = vmul.f32 0.00390625, %v367_v62  ;;  %393 = vadd.xlane.f32.xlu0 %v392_v61  ;;  %v386_v0 = vmul.f32 %v1580_v59, %v1580_v59  ;;  %v387_v1 = vmul.f32 %v1582_v60, %v1582_v60  ;;  %685 = vmatpush1.bf16.msra.mxu1 %v1255_v22  ;;  %v443_v61 = vrot.slane %v1563_v14, %v442_v48 }
 0x1bd   : > { %686 = vmatprep.subr.bf16.mxu1 %v1256_v23 }
 0x1be   : > { %v1588_v2 = vsub.f32 %v351_v29, %v374_v63  ;;  %v1590_v3 = vsub.f32 %v353_v31, %v374_v63  ;;  %v395_v4 = vadd.f32 %v387_v1, %v386_v0  ;;  %v1265_v29 = vld [vmem:[#allocation2 + $0xc4] ss:$8 sps:$4 sm:$0xff]   ;;  %v1268_v31 = vld [vmem:[#allocation2 + $0xd4] ss:$8 sps:$4 sm:$0xff]  }
 0x1bf   : > { %v370_v5 = vpop.xlane.xlu1 %369 }
 0x1c0   : > { %v375_v6 = vmul.f32 0.00390625, %v370_v5  ;;  %396 = vadd.xlane.f32.xlu1 %v395_v4  ;;  %v388_v7 = vmul.f32 %v1588_v2, %v1588_v2  ;;  %v389_v8 = vmul.f32 %v1590_v3, %v1590_v3  ;;  %687 = vmatpush1.bf16.msra.mxu1 %v1258_v24 }
 0x1c1   : > { %688 = vmatprep.subr.bf16.mxu1 %v1259_v25 }
 0x1c2   : > { %v1596_v9 = vsub.f32 %v355_v34, %v375_v6  ;;  %v1598_v10 = vsub.f32 %v357_v35, %v375_v6  ;;  %v398_v11 = vadd.f32 %v389_v8, %v388_v7  ;;  %v1273_v34 = vld [vmem:[#allocation2 + $0xe0] ss:$8 sps:$4 sm:$0xff]   ;;  %v1274_v35 = vld [vmem:[#allocation2 + $0xf4] ss:$8 sps:$4 sm:$0xff]  }
 0x1c4   : > { %399 = vadd.xlane.f32.xlu0 %v398_v11  ;;  %v390_v13 = vmul.f32 %v1596_v9, %v1596_v9  ;;  %v391_v16 = vmul.f32 %v1598_v10, %v1598_v10  ;;  %689 = vmatpush1.bf16.msra.mxu1 %v1261_v26 }
 0x1c5   : > { %690 = vmatprep.subr.bf16.mxu1 %v1262_v27 }
 0x1c6   : > { %v401_v17 = vadd.f32 %v391_v16, %v390_v13 }
 0x1c8   : > { %402 = vadd.xlane.f32.xlu1 %v401_v17  ;;  %691 = vmatpush1.bf16.msra.mxu1 %v1264_v28 }
 0x1c9   : > { %692 = vmatprep.subr.bf16.mxu1 %v1265_v29 }
 0x1cc   : > { %693 = vmatpush1.bf16.msra.mxu1 %v1267_v30 }
 0x1cd   : > { %694 = vmatprep.subr.bf16.mxu1 %v1268_v31 }
 0x1d0   : > { %695 = vmatpush1.bf16.msra.mxu1 %v1270_v32 }
 0x1d1   : > { %696 = vmatprep.subr.bf16.mxu1 %v1271_v33 }
 0x1d4   : > { %697 = vmatpush1.bf16.msra.mxu1 %v1273_v34  ;;  %v502_v34 = vsub.s32 3, %v1557_v12 }
 0x1d5   : > { %698 = vmatprep.subr.bf16.mxu1 %v1274_v35 }
 0x1d6   : > { %v503_v35 = vrot.slane %v1563_v14, %v502_v34 }
 0x1d8   : > { %699 = vmatpush1.bf16.msra.mxu1 %v1276_v36  ;;  %v507_v36 = vrot.slane %v1568_v15, %v502_v34  ;;  %v1287_v34 = vld [vmem:[#allocation4 + $0x68] sm:$0xff]  }
 0x249   : > { %v394_v37 = vpop.xlane.xlu0 %393 }
 0x24a   : > { %v404_v38 = vmul.f32 0.00390625, %v394_v37 }
 0x24c   : > { %v408_v39 = vadd.f32 1e-05, %v404_v38 }
 0x24d   : > { %v397_v40 = vpop.xlane.xlu1 %396 }
 0x24e   : > { %1293 = vrsqrt.f32 %v408_v39  ;;  %v405_v41 = vmul.f32 0.00390625, %v397_v40 }
 0x250   : > { %v409_v42 = vadd.f32 1e-05, %v405_v41 }
 0x251   : > { %v400_v43 = vpop.xlane.xlu0 %399 }
 0x252   : > { %1295 = vrsqrt.f32 %v409_v42  ;;  %v406_v44 = vmul.f32 0.00390625, %v400_v43 }
 0x254   : > { %v410_v46 = vadd.f32 1e-05, %v406_v44 }
 0x255   : > { %v403_v47 = vpop.xlane.xlu1 %402 }
 0x256   : > { %1297 = vrsqrt.f32 %v410_v46  ;;  %v407_v49 = vmul.f32 0.00390625, %v403_v47 }
 0x258   : > { %v1294_v52 = vpop.eup %1293  ;;  %v411_v55 = vadd.f32 1e-05, %v407_v49 }
 0x259   : > { %v416_v56 = vmul.f32 %v1294_v52, %v1572_v53  ;;  %v417_v57 = vmul.f32 %v1294_v52, %v1574_v54 }
 0x25a   : > { %1299 = vrsqrt.f32 %v411_v55 }
 0x25b   : > { %v432_v62 = vmul.f32 %v427_v50, %v416_v56  ;;  %v433_v63 = vmul.f32 %v431_v51, %v417_v57 }
 0x25c   : > { %v1296_v0 = vpop.eup %1295 }
 0x25d   : > { %v418_v1 = vmul.f32 %v1296_v0, %v1580_v59  ;;  %v419_v4 = vmul.f32 %v1296_v0, %v1582_v60  ;;  %v449_v5 = vadd.f32 %v447_v58, %v433_v63  ;;  %v448_v6 = vadd.f32 %v443_v61, %v432_v62 }
 0x25f   : > { %v434_v7 = vmul.f32 %v427_v50, %v418_v1  ;;  %v435_v8 = vmul.f32 %v431_v51, %v419_v4  ;;  %1301 = vtanh.f32 %v449_v5 }
 0x260   : > { %v1298_v11 = vpop.eup %1297  ;;  %1303 = vtanh.f32 %v448_v6 }
 0x261   : > { %v420_v53 = vmul.f32 %v1298_v11, %v1588_v2  ;;  %v421_v54 = vmul.f32 %v1298_v11, %v1590_v3  ;;  %v451_v13 = vadd.f32 %v447_v58, %v435_v8  ;;  %v450_v16 = vadd.f32 %v443_v61, %v434_v7 }
 0x263   : > { %v436_v17 = vmul.f32 %v427_v50, %v420_v53  ;;  %v437_v18 = vmul.f32 %v431_v51, %v421_v54  ;;  %1305 = vtanh.f32 %v451_v13 }
 0x264   : > { %v1300_v19 = vpop.eup %1299  ;;  %1307 = vtanh.f32 %v450_v16 }
 0x265   : > { %v422_v59 = vmul.f32 %v1300_v19, %v1596_v9  ;;  %v423_v60 = vmul.f32 %v1300_v19, %v1598_v10  ;;  %v453_v20 = vadd.f32 %v447_v58, %v437_v18  ;;  %v452_v21 = vadd.f32 %v443_v61, %v436_v17 }
 0x267   : > { %v438_v22 = vmul.f32 %v427_v50, %v422_v59  ;;  %v439_v23 = vmul.f32 %v431_v51, %v423_v60  ;;  %1309 = vtanh.f32 %v453_v20 }
 0x268   : > { %1311 = vtanh.f32 %v452_v21 }
 0x269   : > { %v455_v24 = vadd.f32 %v447_v58, %v439_v23  ;;  %v454_v2 = vadd.f32 %v443_v61, %v438_v22  ;;  %v1302_v3 = vpop.eup %1301 }
 0x26a   : > { %v1304_v25 = vpop.eup %1303 }
 0x26b   : > { %1313 = vtanh.f32 %v455_v24 }
 0x26c   : > { %1315 = vtanh.f32 %v454_v2 }
 0x26d   : > { %v1306_v26 = vpop.eup %1305 }
 0x26e   : > { %v1308_v27 = vpop.eup %1307  ;;  %v465_v28 = vpack.c.bf16 %v1306_v26, %v1302_v3  ;;  %v1277_v26 = vld [vmem:[#allocation4 + $0x40] sm:$0xff]  }
 0x26f   : > { %v464_v29 = vpack.c.bf16 %v1308_v27, %v1304_v25  ;;  %v1278_v27 = vld [vmem:[#allocation4] sm:$0xff]   ;;  %1161 = vmatprep.subr.bf16.mxu0 %v1277_v26 }
 0x270   : > { %700 = vmatprep.mubr.bf16.mxu1 %v465_v28  ;;  %1162 = vmatpush3.bf16.msra.mxu0 %v1278_v27  ;;  %v1279_v28 = vld [vmem:[#allocation4 + $0x48] sm:$0xff]  }
 0x271   : > { %701 = vmatmul.mubr.bf16.vlgmr.msra.gmra.mrb[0].mxu1 %v464_v29  ;;  %v1310_v9 = vpop.eup %1309  ;;  %v1280_v29 = vld [vmem:[#allocation4 + $0x8] sm:$0xff]   ;;  %1163 = vmatprep.subr.bf16.mxu0 %v1279_v28 }
 0x272   : > { %v1312_v10 = vpop.eup %1311 }
 0x274   : > { %1164 = vmatpush3.bf16.msra.mxu0 %v1280_v29 }
 0x275   : > { %v1314_v30 = vpop.eup %1313 }
 0x276   : > { %v1316_v31 = vpop.eup %1315  ;;  %v467_v32 = vpack.c.bf16 %v1314_v30, %v1310_v9  ;;  %v1281_v9 = vld [vmem:[#allocation4 + $0x50] sm:$0xff]   ;;  %v1283_v30 = vld [vmem:[#allocation4 + $0x58] sm:$0xff]  }
 0x277   : > { %v466_v33 = vpack.c.bf16 %v1316_v31, %v1312_v10  ;;  %v1282_v10 = vld [vmem:[#allocation4 + $0x10] sm:$0xff]   ;;  %1165 = vmatprep.subr.bf16.mxu0 %v1281_v9  ;;  %v1284_v31 = vld [vmem:[#allocation4 + $0x18] sm:$0xff]  }
 0x278   : > { %710 = vmatprep.mubr.bf16.mxu1 %v467_v32  ;;  %1166 = vmatpush3.bf16.msra.mxu0 %v1282_v10  ;;  %v1285_v32 = vld [vmem:[#allocation4 + $0x60] sm:$0xff]  }
 0x279   : > { %711 = vmatmul.mubr.bf16.gmra.mrb[4].mxu1 %v466_v33  ;;  %1167 = vmatprep.subr.bf16.mxu0 %v1283_v30  ;;  %v1286_v33 = vld [vmem:[#allocation4 + $0x20] sm:$0xff]  }
 0x27c   : > { %1168 = vmatpush3.bf16.msra.mxu0 %v1284_v31 }
 0x27d   : > { %1169 = vmatprep.subr.bf16.mxu0 %v1285_v32 }
 0x280   : > { %1170 = vmatpush3.bf16.msra.mxu0 %v1286_v33 }
 0x281   : > { %1171 = vmatprep.subr.bf16.mxu0 %v1287_v34 }
 0x344   : > { %v702_v37 = vpop.f32.mrb[0].mxu1 }
 0x345   : > { %v703_v38 = vadd.f32 %v702_v37, %v503_v35  ;;  %v704_v39 = vpop.f32.mrb[1].mxu1  ;;  %v1290_v37 = vld [vmem:[#allocation4 + $0x30] sm:$0xff]  }
 0x346   : > { %v705_v40 = vadd.f32 %v704_v39, %v507_v36  ;;  %v706_v41 = vpop.f32.mrb[2].mxu1  ;;  %v1292_v39 = vld [vmem:[#allocation4 + $0x38] sm:$0xff]  }
 0x347   : > { %v707_v42 = vadd.f32 %v706_v41, %v503_v35  ;;  %v708_v43 = vpop.f32.mrb[3].mxu1 }
 0x348   : > { %v709_v44 = vadd.f32 %v708_v43, %v507_v36  ;;  %v721_v45 = vadd.f32 %v705_v40, %v703_v38 }
 0x34a   : > { %722 = vadd.xlane.f32.xlu0 %v721_v45  ;;  %v724_v46 = vadd.f32 %v709_v44, %v707_v42 }
 0x34c   : > { %725 = vadd.xlane.f32.xlu1 %v724_v46  ;;  %v712_v47 = vpop.f32.mrb[4].mxu1 }
 0x34d   : > { %v713_v48 = vadd.f32 %v712_v47, %v503_v35  ;;  %v714_v49 = vpop.f32.mrb[5].mxu1 }
 0x34e   : > { %v715_v50 = vadd.f32 %v714_v49, %v507_v36  ;;  %v716_v51 = vpop.f32.mrb[6].mxu1 }
 0x34f   : > { %v717_v52 = vadd.f32 %v716_v51, %v503_v35  ;;  %v718_v55 = vpop.f32.mrb[7].mxu1  ;;  %v1288_v35 = vld [vmem:[#allocation4 + $0x28] sm:$0xff]  }
 0x350   : > { %v719_v56 = vadd.f32 %v718_v55, %v507_v36  ;;  %v727_v57 = vadd.f32 %v715_v50, %v713_v48  ;;  %1172 = vmatpush3.bf16.msra.mxu0 %v1288_v35  ;;  %v1289_v36 = vld [vmem:[#allocation4 + $0x70] sm:$0xff]  }
 0x351   : > { %1173 = vmatprep.subr.bf16.mxu0 %v1289_v36  ;;  %v863_v36 = vsub.s32 6, %v1557_v12 }
 0x352   : > { %728 = vadd.xlane.f32.xlu0 %v727_v57  ;;  %v730_v58 = vadd.f32 %v719_v56, %v717_v52 }
 0x354   : > { %731 = vadd.xlane.f32.xlu1 %v730_v58  ;;  %1174 = vmatpush3.bf16.msra.mxu0 %v1290_v37 }
 0x3d7   : > { %v723_v61 = vpop.xlane.xlu0 %722 }
 0x3d8   : > { %v733_v62 = vmul.f32 0.00390625, %v723_v61 }
 0x3d9   : > { %v726_v63 = vpop.xlane.xlu1 %725 }
 0x3da   : > { %v1621_v0 = vsub.f32 %v703_v38, %v733_v62  ;;  %v1623_v1 = vsub.f32 %v705_v40, %v733_v62  ;;  %v734_v4 = vmul.f32 0.00390625, %v726_v63  ;;  %v1291_v38 = vld [vmem:[#allocation4 + $0x78] sm:$0xff]  }
 0x3db   : > { %1175 = vmatprep.subr.bf16.mxu0 %v1291_v38  ;;  %v864_v38 = vrot.slane %v1563_v14, %v863_v36 }
 0x3dc   : > { %v1625_v5 = vsub.f32 %v707_v42, %v734_v4  ;;  %v1627_v6 = vsub.f32 %v709_v44, %v734_v4  ;;  %v745_v7 = vmul.f32 %v1621_v0, %v1621_v0  ;;  %v746_v8 = vmul.f32 %v1623_v1, %v1623_v1  ;;  %1176 = vmatpush3.bf16.msra.mxu0 %v1292_v39 }
 0x3de   : > { %v753_v11 = vadd.f32 %v746_v8, %v745_v7  ;;  %v747_v53 = vmul.f32 %v1625_v5, %v1625_v5  ;;  %v748_v54 = vmul.f32 %v1627_v6, %v1627_v6 }
 0x3df   : > { %v729_v13 = vpop.xlane.xlu0 %728 }
 0x3e0   : > { %v735_v16 = vmul.f32 0.00390625, %v729_v13  ;;  %754 = vadd.xlane.f32.xlu0 %v753_v11  ;;  %v756_v17 = vadd.f32 %v748_v54, %v747_v53 }
 0x3e1   : > { %v732_v18 = vpop.xlane.xlu1 %731 }
 0x3e2   : > { %v1637_v19 = vsub.f32 %v713_v48, %v735_v16  ;;  %v1639_v59 = vsub.f32 %v715_v50, %v735_v16  ;;  %v736_v60 = vmul.f32 0.00390625, %v732_v18  ;;  %757 = vadd.xlane.f32.xlu1 %v756_v17  ;;  %v787_v48 = vsub.s32 4, %v1557_v12 }
 0x3e4   : > { %v1641_v20 = vsub.f32 %v717_v52, %v736_v60  ;;  %v1643_v21 = vsub.f32 %v719_v56, %v736_v60  ;;  %v749_v22 = vmul.f32 %v1637_v19, %v1637_v19  ;;  %v750_v23 = vmul.f32 %v1639_v59, %v1639_v59 }
 0x3e5   : > { %v803_v52 = vsub.s32 5, %v1557_v12  ;;  %v788_v56 = vrot.slane %v1563_v14, %v787_v48  ;;  %v792_v57 = vrot.slane %v1568_v15, %v787_v48 }
 0x3e6   : > { %v759_v24 = vadd.f32 %v750_v23, %v749_v22  ;;  %v751_v2 = vmul.f32 %v1641_v20, %v1641_v20  ;;  %v752_v3 = vmul.f32 %v1643_v21, %v1643_v21 }
 0x3e7   : > { %v804_v61 = vrot.slane %v1563_v14, %v803_v52  ;;  %v808_v4 = vrot.slane %v1568_v15, %v803_v52 }
 0x3e8   : > { %760 = vadd.xlane.f32.xlu0 %v759_v24  ;;  %v762_v25 = vadd.f32 %v752_v3, %v751_v2 }
 0x3ea   : > { %763 = vadd.xlane.f32.xlu1 %v762_v25 }
 0x46d   : > { %v755_v40 = vpop.xlane.xlu0 %754 }
 0x46e   : > { %v765_v41 = vmul.f32 0.00390625, %v755_v40 }
 0x46f   : > { %v758_v42 = vpop.xlane.xlu1 %757 }
 0x470   : > { %v769_v43 = vadd.f32 1e-05, %v765_v41  ;;  %v766_v44 = vmul.f32 0.00390625, %v758_v42 }
 0x472   : > { %1317 = vrsqrt.f32 %v769_v43  ;;  %v770_v45 = vadd.f32 1e-05, %v766_v44 }
 0x474   : > { %1319 = vrsqrt.f32 %v770_v45 }
 0x475   : > { %v761_v46 = vpop.xlane.xlu0 %760 }
 0x476   : > { %v767_v47 = vmul.f32 0.00390625, %v761_v46 }
 0x477   : > { %v764_v49 = vpop.xlane.xlu1 %763 }
 0x478   : > { %v771_v50 = vadd.f32 1e-05, %v767_v47  ;;  %v768_v51 = vmul.f32 0.00390625, %v764_v49 }
 0x47a   : > { %1321 = vrsqrt.f32 %v771_v50  ;;  %v772_v55 = vadd.f32 1e-05, %v768_v51 }
 0x47c   : > { %v1318_v58 = vpop.eup %1317  ;;  %1323 = vrsqrt.f32 %v772_v55 }
 0x47d   : > { %v777_v62 = vmul.f32 %v1318_v58, %v1621_v0  ;;  %v778_v63 = vmul.f32 %v1318_v58, %v1623_v1 }
 0x47e   : > { %v1320_v7 = vpop.eup %1319 }
 0x47f   : > { %v793_v8 = vmul.f32 %v788_v56, %v777_v62  ;;  %v794_v11 = vmul.f32 %v792_v57, %v778_v63  ;;  %v779_v53 = vmul.f32 %v1320_v7, %v1625_v5  ;;  %v780_v54 = vmul.f32 %v1320_v7, %v1627_v6 }
 0x481   : > { %v809_v13 = vadd.f32 %v804_v61, %v793_v8  ;;  %v795_v16 = vmul.f32 %v788_v56, %v779_v53  ;;  %v796_v17 = vmul.f32 %v792_v57, %v780_v54  ;;  %v810_v18 = vadd.f32 %v808_v4, %v794_v11 }
 0x483   : > { %1325 = vtanh.f32 %v809_v13  ;;  %v811_v60 = vadd.f32 %v804_v61, %v795_v16  ;;  %v812_v22 = vadd.f32 %v808_v4, %v796_v17 }
 0x484   : > { %v1322_v23 = vpop.eup %1321  ;;  %1327 = vtanh.f32 %v810_v18 }
 0x485   : > { %1329 = vtanh.f32 %v811_v60  ;;  %v781_v0 = vmul.f32 %v1322_v23, %v1637_v19  ;;  %v782_v15 = vmul.f32 %v1322_v23, %v1639_v59 }
 0x486   : > { %v1324_v1 = vpop.eup %1323  ;;  %1331 = vtanh.f32 %v812_v22 }
 0x487   : > { %v797_v24 = vmul.f32 %v788_v56, %v781_v0  ;;  %v798_v5 = vmul.f32 %v792_v57, %v782_v15  ;;  %v783_v6 = vmul.f32 %v1324_v1, %v1641_v20  ;;  %v784_v2 = vmul.f32 %v1324_v1, %v1643_v21 }
 0x489   : > { %v799_v3 = vmul.f32 %v788_v56, %v783_v6  ;;  %v800_v25 = vmul.f32 %v792_v57, %v784_v2  ;;  %v814_v26 = vadd.f32 %v808_v4, %v798_v5  ;;  %v813_v27 = vadd.f32 %v804_v61, %v797_v24 }
 0x48b   : > { %v816_v28 = vadd.f32 %v808_v4, %v800_v25  ;;  %1333 = vtanh.f32 %v814_v26  ;;  %v815_v29 = vadd.f32 %v804_v61, %v799_v3 }
 0x48c   : > { %1335 = vtanh.f32 %v813_v27 }
 0x48d   : > { %v1326_v9 = vpop.eup %1325  ;;  %1337 = vtanh.f32 %v816_v28 }
 0x48e   : > { %v1328_v19 = vpop.eup %1327  ;;  %1339 = vtanh.f32 %v815_v29 }
 0x48f   : > { %v1330_v59 = vpop.eup %1329 }
 0x490   : > { %v1332_v10 = vpop.eup %1331  ;;  %v825_v30 = vpack.c.bf16 %v1330_v59, %v1326_v9 }
 0x491   : > { %v826_v31 = vpack.c.bf16 %v1332_v10, %v1328_v19 }
 0x493   : > { %993 = vmatprep.mubr.bf16.mxu0 %v826_v31 }
 0x494   : > { %994 = vmatmul.mubr.bf16.vlgmr.msra.gmra.mrb[8].mxu0 %v825_v30 }
 0x495   : > { %v1334_v20 = vpop.eup %1333 }
 0x496   : > { %v1336_v21 = vpop.eup %1335 }
 0x497   : > { %v1338_v32 = vpop.eup %1337 }
 0x498   : > { %v1340_v33 = vpop.eup %1339  ;;  %v828_v34 = vpack.c.bf16 %v1338_v32, %v1334_v20 }
 0x499   : > { %v827_v35 = vpack.c.bf16 %v1340_v33, %v1336_v21 }
 0x49a   : > { %1001 = vmatprep.mubr.bf16.mxu0 %v828_v34 }
 0x49c   : > { %1002 = vmatmul.mubr.bf16.gmra.mrb[12].mxu0 %v827_v35 }
 0x567   : > { %v1177_v37 = vpop.f32.mrb[8].mxu0 }
 0x568   : > { %v1178_v39 = vpop.f32.mrb[9].mxu0 }
 0x569   : > { %v1179_v40 = vadd.f32 %v1178_v39, %v1177_v37  ;;  %v1180_v41 = vpop.f32.mrb[10].mxu0 }
 0x56a   : > { %v1181_v42 = vpop.f32.mrb[11].mxu0 }
 0x56b   : > { %v996_v43 = vadd.f32 %v1179_v40, %v864_v38  ;;  %v1182_v44 = vadd.f32 %v1181_v42, %v1180_v41 }
 0x56d   : > { %1010 = vst [vmem:[%s256_s20] sm:$0xff] %v996_v43  ;;  %v999_v45 = vadd.f32 %v1182_v44, %v864_v38 }
 0x56f   : > { %1011 = vst [vmem:[%s256_s20 + $0x8] sm:$0xff] %v999_v45  ;;  %v1183_v46 = vpop.f32.mrb[12].mxu0 }
 0x570   : > { %v1184_v47 = vpop.f32.mrb[13].mxu0 }
 0x571   : > { %v1185_v12 = vadd.f32 %v1184_v47, %v1183_v46  ;;  %v1186_v48 = vpop.f32.mrb[14].mxu0 }
 0x572   : > { %v1187_v49 = vpop.f32.mrb[15].mxu0 }
 0x573   : > { %v1004_v14 = vadd.f32 %v1185_v12, %v864_v38  ;;  %v1188_v50 = vadd.f32 %v1187_v49, %v1186_v48 }
 0x575   : > { %1012 = vst [vmem:[%s256_s20 + $0x10] sm:$0xff] %v1004_v14  ;;  %v1007_v51 = vadd.f32 %v1188_v50, %v864_v38 }
 0x577   : > { %1013 = vst [vmem:[%s256_s20 + $0x18] sm:$0xff] %v1007_v51 }
 0x578 PF: > { %s17_s18 = sadd.s32 1, %s1411_s18  }
 0x579   : > { %p14_p2 = scmp.ge.s32.totalorder %s17_s18, 4  }
 0x57b   :  { %16 = sbr.rel (!%p14_p2) target bundleno = 2 (0x2), region = 79 }
 0x582   :  { %1036 = vsyncpa [#allocation3], 1 }
 0x583   :  { %1038 = vsyncpa [#allocation3 + $0x1], 1 }
 0x584   :  { %1039 = vsyncpa [#allocation5], 1 }

</bundles_post_ra>
